<compile_context>
chip_gen: v7x
topology: tpu7x:2x2x1
jax: 0.10.0
libtpu: 0.0.40
codegen_flags: <defaults>
</compile_context>

<pallas_src>
import math

import jax
import jax.numpy as jnp
from jax.experimental import pallas as pl
from jax.experimental.pallas import tpu as pltpu


def _round_up(n, m):
    return ((n + m - 1) // m) * m


def _ckconv_kernel(x_ref, w_ref, b_ref, o_ref, carry_ref, win_ref, acc_ref):
    # x_ref:     (1, Cin_p, Lt)       current time tile (Lt multiple of 128)
    # w_ref:     (Kp, Cout_p, Cin_p)  tap-major weight, resident (Buffered(1))
    # b_ref:     (Cout_p, 1)          bias (fp32), resident
    # o_ref:     (1, Cout_p, Lt)      output tile
    # carry_ref: (Cin_p, H)           last H samples of the previous tile
    # win_ref:   (Cin_p, Hp + Lt)     causal window, Hp = roundup(H, 128)
    # acc_ref:   (Cout_p, Lt)         fp32 accumulator
    j = pl.program_id(1)
    lt = x_ref.shape[2]
    h = carry_ref.shape[-1]
    kp = h + 1
    hp = win_ref.shape[-1] - lt
    s0 = hp - h

    # Causal start of each sequence: no history.
    @pl.when(j == 0)
    def _():
        carry_ref[...] = jnp.zeros_like(carry_ref)

    # Assemble the causal window: [zeros | prev-tile tail | current tile].
    # The bulk store of the current tile lands at a lane-aligned offset
    # (hp is a multiple of 128).
    win_ref[:, s0:hp] = carry_ref[...]
    win_ref[:, hp:] = x_ref[0]
    # Save this tile's tail for the next time tile (read-before-write above).
    carry_ref[...] = x_ref[0, :, lt - h:]

    # Chunked contraction: one small MXU matmul per tap with fp32 accumulation
    # in VMEM.  No (Kp*Cin, Lt) im2col patch; the shifted-window load of tap
    # k+1 overlaps the MXU consuming tap k.
    acc_ref[...] = jnp.zeros_like(acc_ref)
    if kp <= 32:
        for k in range(kp):
            acc_ref[...] += jnp.dot(w_ref[k], win_ref[:, s0 + k:s0 + k + lt],
                                    preferred_element_type=jnp.float32)
    else:
        # TODO(synk): very long ckconv kernels (kernel_size ~ L) should use
        # the fftconv path instead of this rolled per-tap loop.
        @pl.loop(0, kp)
        def _(k):
            acc_ref[...] += jnp.dot(w_ref[k], win_ref[:, pl.ds(s0 + k, lt)],
                                    preferred_element_type=jnp.float32)

    o_ref[0] = (acc_ref[...] + b_ref[...]).astype(o_ref.dtype)


def causal_conv1d(x, weight, bias=None, *, time_tile=None,
                  compute_dtype=jnp.bfloat16):
    """x: (B, Cin, L); weight: (Cout, Cin, K); bias: (Cout,) -> (B, Cout, L)."""
    B, Cin, L = x.shape
    Cout, _, K = weight.shape
    out_dtype = x.dtype
    if bias is None:
        bias = jnp.zeros((Cout,), jnp.float32)

    # ckconv rule: even-sized kernels get one zero of left padding.
    if K % 2 == 0:
        weight = jnp.pad(weight, ((0, 0), (0, 0), (1, 0)))
    # Keep at least one halo column so the kernel structure is uniform (the
    # extra zero tap is mathematically inert for the causal conv).
    if weight.shape[-1] < 2:
        weight = jnp.pad(weight, ((0, 0), (0, 0), (2 - weight.shape[-1], 0)))
    Kp = weight.shape[-1]
    H = Kp - 1

    # Sublane packing for the compute dtype (16 for bf16, 8 for f32).
    cbytes = jnp.dtype(compute_dtype).itemsize
    obytes = jnp.dtype(out_dtype).itemsize
    sub = 8 * max(1, 4 // cbytes)
    Cin_p = _round_up(Cin, sub)
    Cout_p = _round_up(Cout, sub)

    # Physical VMEM of this generation (v7x: 64 MiB/TC, v5e/v6e: 128 MiB).
    try:
        vmem_cap = int(pltpu.get_tpu_info().vmem_capacity_bytes)
    except Exception:
        vmem_cap = 64 << 20

    if time_tile is None:
        time_tile = 1024 if vmem_cap >= (96 << 20) else 512

    Hp = _round_up(H, 128)
    Lmax = _round_up(L, 128)
    Lt = min(_round_up(max(time_tile, 128), 128), Lmax)
    Lt = max(Lt, Hp)          # in-kernel carry requires H <= Lt

    def vmem_need(lt):
        return (2 * Cin_p * lt * cbytes                 # x tile (2-buffered)
                + Kp * Cout_p * Cin_p * cbytes          # weight (1-buffered)
                + Cout_p * 4                            # bias
                + 2 * Cout_p * lt * obytes              # output tile (2-buf)
                + Cin_p * H * cbytes                    # causal carry
                + Cin_p * (Hp + lt) * cbytes            # window scratch
                + Cout_p * lt * 4)                      # fp32 accumulator

    # Shrink the time tile until the working set fits well inside VMEM.
    budget = int(0.45 * vmem_cap)
    while Lt > max(128, Hp) and vmem_need(Lt) > budget:
        Lt -= 128

    nT = pl.cdiv(L, Lt)
    Lpad = nT * Lt

    # Single fused pad+cast of x (channel + time) — one HBM round trip.
    x_c = jnp.pad(
        x, ((0, 0), (0, Cin_p - Cin), (0, Lpad - L))).astype(compute_dtype)

    # Tap-major weight (Kp, Cout_p, Cin_p): W3[k, o, c] = weight[o, c, k].
    w_p = jnp.pad(weight, ((0, Cout_p - Cout), (0, Cin_p - Cin), (0, 0)))
    w3d = jnp.transpose(w_p, (2, 0, 1)).astype(compute_dtype)
    b_col = jnp.pad(bias, ((0, Cout_p - Cout),)).reshape(
        Cout_p, 1).astype(jnp.float32)

    need = vmem_need(Lt)
    vmem_limit = int(min(max(2 * need, 16 << 20), (vmem_cap * 4) // 5))
    vmem_limit = min(max(vmem_limit, need + (2 << 20)), vmem_cap)

    cost = pl.CostEstimate(
        flops=int(2 * B * Cout_p * Kp * Cin_p * Lpad),
        transcendentals=0,
        bytes_accessed=int(x_c.size * cbytes + w3d.size * cbytes
                           + b_col.size * 4 + B * Cout_p * Lpad * obytes))

    # Grid: (batch, time-tiles).  Batch is "parallel" (megacore sharding: on
    # v7x keep B >= 2 so both TensorCores get work); the time axis carries the
    # causal history in a VMEM scratch, hence "arbitrary".
    # TODO(synk): for very wide Cout (>= 256) add an inner Cout grid axis so
    # only a Cout-tile of the weight / accumulator is resident per step.
    out = pl.pallas_call(
        _ckconv_kernel,
        out_shape=jax.ShapeDtypeStruct((B, Cout_p, Lpad), out_dtype),
        grid_spec=pltpu.PrefetchScalarGridSpec(
            num_scalar_prefetch=0,
            grid=(B, nT),
            in_specs=[
                pl.BlockSpec((1, Cin_p, Lt), lambda b, j: (b, 0, j)),
                pl.BlockSpec((Kp, Cout_p, Cin_p), lambda b, j: (0, 0, 0),
                             pipeline_mode=pl.Buffered(1)),
                pl.BlockSpec((Cout_p, 1), lambda b, j: (0, 0),
                             pipeline_mode=pl.Buffered(1)),
            ],
            out_specs=pl.BlockSpec((1, Cout_p, Lt), lambda b, j: (b, 0, j)),
            scratch_shapes=[
                pltpu.VMEM((Cin_p, H), compute_dtype),        # causal carry
                pltpu.VMEM((Cin_p, Hp + Lt), compute_dtype),  # window
                pltpu.VMEM((Cout_p, Lt), jnp.float32),        # accumulator
            ],
        ),
        compiler_params=pltpu.CompilerParams(
            dimension_semantics=("parallel", "arbitrary"),
            vmem_limit_bytes=vmem_limit),
        cost_estimate=cost,
    )(x_c, w3d, b_col)

    return out[:, :Cout, :L]


def init_conv_params(key, in_channels, out_channels, kernel_size,
                     dtype=jnp.float32):
    """Deterministic re-implementation of the PyTorch init in ConvBase."""
    kw, kb = jax.random.split(key)
    fan_in = in_channels * kernel_size
    # kaiming_uniform_(a=sqrt(5)) -> bound = 1/sqrt(fan_in); same for bias.
    bound = 1.0 / math.sqrt(fan_in)
    weight = jax.random.uniform(
        kw, (out_channels, in_channels, kernel_size),
        minval=-bound, maxval=bound, dtype=dtype)
    bias = jax.random.uniform(
        kb, (out_channels,), minval=-bound, maxval=bound, dtype=dtype)
    return weight, bias


class Conv:
    """JAX/Pallas equivalent of ckconv `Conv` (data_dim=1, separable=False)."""

    def __init__(self, in_channels, out_channels, kernel_size, key):
        self.in_channels = in_channels
        self.out_channels = out_channels
        self.kernel_size = kernel_size
        self.weight, self.bias = init_conv_params(
            key, in_channels, out_channels, kernel_size)
        # TODO(synk): fftconv / data_dim>1 / separable=True ckconv variants
        # are out of scope for data_dim=1, use_fft=False and not implemented.

    def __call__(self, x, **kwargs):
        return causal_conv1d(x, self.weight, self.bias, **kwargs)


def _reference(x, weight, bias):
    """Pure-JAX reference of the same causal conv (cross-correlation)."""
    Cout, Cin, K = weight.shape
    if K % 2 == 0:
        weight = jnp.pad(weight, ((0, 0), (0, 0), (1, 0)))
    Kp = weight.shape[-1]
    x_pad = jnp.pad(x, ((0, 0), (0, 0), (Kp - 1, 0)))
    out = jax.lax.conv_general_dilated(
        x_pad, weight, window_strides=(1,), padding="VALID",
        dimension_numbers=("NCH", "OIH", "NCH"),
        precision=jax.lax.Precision.HIGHEST)
    return out + bias[None, :, None]


def _check(B, Cin, Cout, L, K, key, **kwargs):
    kp, kx = jax.random.split(key)
    conv = Conv(Cin, Cout, K, kp)
    x = jax.random.normal(kx, (B, Cin, L), dtype=jnp.float32)
    y = jax.block_until_ready(conv(x, **kwargs))
    # Reference on bf16-rounded operands (kernel stores bf16, accumulates f32).
    xr = x.astype(jnp.bfloat16).astype(jnp.float32)
    wr = conv.weight.astype(jnp.bfloat16).astype(jnp.float32)
    y_ref = _reference(xr, wr, conv.bias)
    assert y.shape == (B, Cout, L), y.shape
    assert jnp.allclose(y, y_ref, atol=2e-3, rtol=2e-3), \
        float(jnp.max(jnp.abs(y - y_ref)))
    return y


if __name__ == "__main__":
    key = jax.random.PRNGKey(0)
    k1, k2 = jax.random.split(key)
    # Small case: even K exercises the left zero tap + channel/time padding.
    _check(2, 4, 6, 16, 4, k1)
    # Multi time-tile case: exercises the cross-tile causal carry path.
    _check(2, 8, 8, 200, 5, k2, time_tile=128)
    print("KERNEL_OK")
</pallas_src>

<mosaic_0001>
module attributes {stable_mosaic.version = 11 : i64} {
  func.func @_ckconv_kernel(%arg0: i32, %arg1: i32, %arg2: memref<1x16x128xbf16, #tpu.memory_space<vmem>>, %arg3: memref<5x16x16xbf16, #tpu.memory_space<vmem>>, %arg4: memref<16x1xf32, #tpu.memory_space<vmem>>, %arg5: memref<1x16x128xf32, #tpu.memory_space<vmem>>, %arg6: memref<16x4xbf16, #tpu.memory_space<vmem>>, %arg7: memref<16x256xbf16, #tpu.memory_space<vmem>>, %arg8: memref<16x128xf32, #tpu.memory_space<vmem>>) attributes {dimension_semantics = [#tpu.dimension_semantics<parallel>, #tpu.dimension_semantics<arbitrary>], iteration_bounds = array<i64: 2, 1>, scalar_prefetch = 0 : i64, scratch_operands = 3 : i64, tpu.core_type = #tpu.core_type<tc>, window_params = [{transform_indices = @transform_0, window_bounds = array<i64: 1, 16, 128>}, {pipeline_mode = #tpu.pipeline_mode<synchronous>, transform_indices = @transform_1, window_bounds = array<i64: 5, 16, 16>}, {pipeline_mode = #tpu.pipeline_mode<synchronous>, transform_indices = @transform_2, window_bounds = array<i64: 16, 1>}, {transform_indices = @transform_3, window_bounds = array<i64: 1, 16, 128>}]} {
    %c0_i32 = arith.constant 0 : i32
    %0 = arith.cmpi eq, %arg1, %c0_i32 : i32
    %1 = arith.extui %0 : i1 to i32
    %c0_i32_0 = arith.constant 0 : i32
    %2 = arith.cmpi ne, %1, %c0_i32_0 : i32
    scf.if %2 {
      %cst_64 = arith.constant 0.000000e+00 : bf16
      %55 = vector.broadcast %cst_64 : bf16 to vector<16x4xbf16>
      %c0_65 = arith.constant 0 : index
      %c0_66 = arith.constant 0 : index
      %56 = vector.load %arg6[%c0_65, %c0_66] : memref<16x4xbf16, #tpu.memory_space<vmem>>, vector<16x4xbf16>
      tpu.vector_store %arg6[%c0_65, %c0_66], %55 {strides = array<i32>} : memref<16x4xbf16, #tpu.memory_space<vmem>>, vector<16x4xbf16>,
    } else {
    }
    %c0 = arith.constant 0 : index
    %c0_1 = arith.constant 0 : index
    %3 = vector.load %arg6[%c0, %c0_1] : memref<16x4xbf16, #tpu.memory_space<vmem>>, vector<16x4xbf16>
    %c0_2 = arith.constant 0 : index
    %c124 = arith.constant 124 : index
    %4 = vector.load %arg7[%c0_2, %c124] : memref<16x256xbf16, #tpu.memory_space<vmem>>, vector<16x4xbf16>
    tpu.vector_store %arg7[%c0_2, %c124], %3 {strides = array<i32>} : memref<16x256xbf16, #tpu.memory_space<vmem>>, vector<16x4xbf16>,
    %c0_3 = arith.constant 0 : index
    %c0_4 = arith.constant 0 : index
    %c0_5 = arith.constant 0 : index
    %5 = vector.load %arg2[%c0_3, %c0_4, %c0_5] : memref<1x16x128xbf16, #tpu.memory_space<vmem>>, vector<1x16x128xbf16>
    %6 = vector.shape_cast %5 : vector<1x16x128xbf16> to vector<16x128xbf16>
    %c0_6 = arith.constant 0 : index
    %c128 = arith.constant 128 : index
    %7 = vector.load %arg7[%c0_6, %c128] : memref<16x256xbf16, #tpu.memory_space<vmem>>, vector<16x128xbf16>
    tpu.vector_store %arg7[%c0_6, %c128], %6 {strides = array<i32>} : memref<16x256xbf16, #tpu.memory_space<vmem>>, vector<16x128xbf16>,
    %c0_7 = arith.constant 0 : index
    %c0_8 = arith.constant 0 : index
    %c124_9 = arith.constant 124 : index
    %8 = vector.load %arg2[%c0_7, %c0_8, %c124_9] : memref<1x16x128xbf16, #tpu.memory_space<vmem>>, vector<1x16x4xbf16>
    %9 = vector.shape_cast %8 : vector<1x16x4xbf16> to vector<16x4xbf16>
    %c0_10 = arith.constant 0 : index
    %c0_11 = arith.constant 0 : index
    %10 = vector.load %arg6[%c0_10, %c0_11] : memref<16x4xbf16, #tpu.memory_space<vmem>>, vector<16x4xbf16>
    tpu.vector_store %arg6[%c0_10, %c0_11], %9 {strides = array<i32>} : memref<16x4xbf16, #tpu.memory_space<vmem>>, vector<16x4xbf16>,
    %cst = arith.constant 0.000000e+00 : f32
    %11 = vector.broadcast %cst : f32 to vector<16x128xf32>
    %c0_12 = arith.constant 0 : index
    %c0_13 = arith.constant 0 : index
    %12 = vector.load %arg8[%c0_12, %c0_13] : memref<16x128xf32, #tpu.memory_space<vmem>>, vector<16x128xf32>
    tpu.vector_store %arg8[%c0_12, %c0_13], %11 {strides = array<i32>} : memref<16x128xf32, #tpu.memory_space<vmem>>, vector<16x128xf32>,
    %c0_14 = arith.constant 0 : index
    %c0_15 = arith.constant 0 : index
    %13 = vector.load %arg8[%c0_14, %c0_15] : memref<16x128xf32, #tpu.memory_space<vmem>>, vector<16x128xf32>
    %c0_16 = arith.constant 0 : index
    %c0_17 = arith.constant 0 : index
    %c0_18 = arith.constant 0 : index
    %14 = vector.load %arg3[%c0_16, %c0_17, %c0_18] : memref<5x16x16xbf16, #tpu.memory_space<vmem>>, vector<1x16x16xbf16>
    %15 = vector.shape_cast %14 : vector<1x16x16xbf16> to vector<16x16xbf16>
    %c0_19 = arith.constant 0 : index
    %c124_20 = arith.constant 124 : index
    %16 = vector.load %arg7[%c0_19, %c124_20] : memref<16x256xbf16, #tpu.memory_space<vmem>>, vector<16x128xbf16>
    %cst_21 = arith.constant dense<0.000000e+00> : vector<16x128xf32>
    %17 = tpu.matmul %15, %16, %cst_21 {dimension_numbers = #tpu.dot_dimension_numbers<[1], [0], [0], [1], [0, 0, 1, 1], [], []>} : vector<16x16xbf16>, vector<16x128xbf16>, vector<16x128xf32> -> vector<16x128xf32>
    %18 = arith.addf %13, %17 : vector<16x128xf32>
    %c0_22 = arith.constant 0 : index
    %c0_23 = arith.constant 0 : index
    %19 = vector.load %arg8[%c0_22, %c0_23] : memref<16x128xf32, #tpu.memory_space<vmem>>, vector<16x128xf32>
    tpu.vector_store %arg8[%c0_22, %c0_23], %18 {strides = array<i32>} : memref<16x128xf32, #tpu.memory_space<vmem>>, vector<16x128xf32>,
    %c0_24 = arith.constant 0 : index
    %c0_25 = arith.constant 0 : index
    %20 = vector.load %arg8[%c0_24, %c0_25] : memref<16x128xf32, #tpu.memory_space<vmem>>, vector<16x128xf32>
    %c1 = arith.constant 1 : index
    %c0_26 = arith.constant 0 : index
    %c0_27 = arith.constant 0 : index
    %21 = vector.load %arg3[%c1, %c0_26, %c0_27] : memref<5x16x16xbf16, #tpu.memory_space<vmem>>, vector<1x16x16xbf16>
    %22 = vector.shape_cast %21 : vector<1x16x16xbf16> to vector<16x16xbf16>
    %c0_28 = arith.constant 0 : index
    %c125 = arith.constant 125 : index
    %23 = vector.load %arg7[%c0_28, %c125] : memref<16x256xbf16, #tpu.memory_space<vmem>>, vector<16x128xbf16>
    %cst_29 = arith.constant dense<0.000000e+00> : vector<16x128xf32>
    %24 = tpu.matmul %22, %23, %cst_29 {dimension_numbers = #tpu.dot_dimension_numbers<[1], [0], [0], [1], [0, 0, 1, 1], [], []>} : vector<16x16xbf16>, vector<16x128xbf16>, vector<16x128xf32> -> vector<16x128xf32>
    %25 = arith.addf %20, %24 : vector<16x128xf32>
    %c0_30 = arith.constant 0 : index
    %c0_31 = arith.constant 0 : index
    %26 = vector.load %arg8[%c0_30, %c0_31] : memref<16x128xf32, #tpu.memory_space<vmem>>, vector<16x128xf32>
    tpu.vector_store %arg8[%c0_30, %c0_31], %25 {strides = array<i32>} : memref<16x128xf32, #tpu.memory_space<vmem>>, vector<16x128xf32>,
    %c0_32 = arith.constant 0 : index
    %c0_33 = arith.constant 0 : index
    %27 = vector.load %arg8[%c0_32, %c0_33] : memref<16x128xf32, #tpu.memory_space<vmem>>, vector<16x128xf32>
    %c2 = arith.constant 2 : index
    %c0_34 = arith.constant 0 : index
    %c0_35 = arith.constant 0 : index
    %28 = vector.load %arg3[%c2, %c0_34, %c0_35] : memref<5x16x16xbf16, #tpu.memory_space<vmem>>, vector<1x16x16xbf16>
    %29 = vector.shape_cast %28 : vector<1x16x16xbf16> to vector<16x16xbf16>
    %c0_36 = arith.constant 0 : index
    %c126 = arith.constant 126 : index
    %30 = vector.load %arg7[%c0_36, %c126] : memref<16x256xbf16, #tpu.memory_space<vmem>>, vector<16x128xbf16>
    %cst_37 = arith.constant dense<0.000000e+00> : vector<16x128xf32>
    %31 = tpu.matmul %29, %30, %cst_37 {dimension_numbers = #tpu.dot_dimension_numbers<[1], [0], [0], [1], [0, 0, 1, 1], [], []>} : vector<16x16xbf16>, vector<16x128xbf16>, vector<16x128xf32> -> vector<16x128xf32>
    %32 = arith.addf %27, %31 : vector<16x128xf32>
    %c0_38 = arith.constant 0 : index
    %c0_39 = arith.constant 0 : index
    %33 = vector.load %arg8[%c0_38, %c0_39] : memref<16x128xf32, #tpu.memory_space<vmem>>, vector<16x128xf32>
    tpu.vector_store %arg8[%c0_38, %c0_39], %32 {strides = array<i32>} : memref<16x128xf32, #tpu.memory_space<vmem>>, vector<16x128xf32>,
    %c0_40 = arith.constant 0 : index
    %c0_41 = arith.constant 0 : index
    %34 = vector.load %arg8[%c0_40, %c0_41] : memref<16x128xf32, #tpu.memory_space<vmem>>, vector<16x128xf32>
    %c3 = arith.constant 3 : index
    %c0_42 = arith.constant 0 : index
    %c0_43 = arith.constant 0 : index
    %35 = vector.load %arg3[%c3, %c0_42, %c0_43] : memref<5x16x16xbf16, #tpu.memory_space<vmem>>, vector<1x16x16xbf16>
    %36 = vector.shape_cast %35 : vector<1x16x16xbf16> to vector<16x16xbf16>
    %c0_44 = arith.constant 0 : index
    %c127 = arith.constant 127 : index
    %37 = vector.load %arg7[%c0_44, %c127] : memref<16x256xbf16, #tpu.memory_space<vmem>>, vector<16x128xbf16>
    %cst_45 = arith.constant dense<0.000000e+00> : vector<16x128xf32>
    %38 = tpu.matmul %36, %37, %cst_45 {dimension_numbers = #tpu.dot_dimension_numbers<[1], [0], [0], [1], [0, 0, 1, 1], [], []>} : vector<16x16xbf16>, vector<16x128xbf16>, vector<16x128xf32> -> vector<16x128xf32>
    %39 = arith.addf %34, %38 : vector<16x128xf32>
    %c0_46 = arith.constant 0 : index
    %c0_47 = arith.constant 0 : index
    %40 = vector.load %arg8[%c0_46, %c0_47] : memref<16x128xf32, #tpu.memory_space<vmem>>, vector<16x128xf32>
    tpu.vector_store %arg8[%c0_46, %c0_47], %39 {strides = array<i32>} : memref<16x128xf32, #tpu.memory_space<vmem>>, vector<16x128xf32>,
    %c0_48 = arith.constant 0 : index
    %c0_49 = arith.constant 0 : index
    %41 = vector.load %arg8[%c0_48, %c0_49] : memref<16x128xf32, #tpu.memory_space<vmem>>, vector<16x128xf32>
    %c4 = arith.constant 4 : index
    %c0_50 = arith.constant 0 : index
    %c0_51 = arith.constant 0 : index
    %42 = vector.load %arg3[%c4, %c0_50, %c0_51] : memref<5x16x16xbf16, #tpu.memory_space<vmem>>, vector<1x16x16xbf16>
    %43 = vector.shape_cast %42 : vector<1x16x16xbf16> to vector<16x16xbf16>
    %c0_52 = arith.constant 0 : index
    %c128_53 = arith.constant 128 : index
    %44 = vector.load %arg7[%c0_52, %c128_53] : memref<16x256xbf16, #tpu.memory_space<vmem>>, vector<16x128xbf16>
    %cst_54 = arith.constant dense<0.000000e+00> : vector<16x128xf32>
    %45 = tpu.matmul %43, %44, %cst_54 {dimension_numbers = #tpu.dot_dimension_numbers<[1], [0], [0], [1], [0, 0, 1, 1], [], []>} : vector<16x16xbf16>, vector<16x128xbf16>, vector<16x128xf32> -> vector<16x128xf32>
    %46 = arith.addf %41, %45 : vector<16x128xf32>
    %c0_55 = arith.constant 0 : index
    %c0_56 = arith.constant 0 : index
    %47 = vector.load %arg8[%c0_55, %c0_56] : memref<16x128xf32, #tpu.memory_space<vmem>>, vector<16x128xf32>
    tpu.vector_store %arg8[%c0_55, %c0_56], %46 {strides = array<i32>} : memref<16x128xf32, #tpu.memory_space<vmem>>, vector<16x128xf32>,
    %c0_57 = arith.constant 0 : index
    %c0_58 = arith.constant 0 : index
    %48 = vector.load %arg8[%c0_57, %c0_58] : memref<16x128xf32, #tpu.memory_space<vmem>>, vector<16x128xf32>
    %c0_59 = arith.constant 0 : index
    %c0_60 = arith.constant 0 : index
    %49 = vector.load %arg4[%c0_59, %c0_60] : memref<16x1xf32, #tpu.memory_space<vmem>>, vector<16x1xf32>
    %50 = vector.broadcast %49 : vector<16x1xf32> to vector<16x128xf32>
    %51 = arith.addf %48, %50 : vector<16x128xf32>
    %c0_61 = arith.constant 0 : index
    %c0_62 = arith.constant 0 : index
    %c0_63 = arith.constant 0 : index
    %52 = vector.load %arg5[%c0_61, %c0_62, %c0_63] : memref<1x16x128xf32, #tpu.memory_space<vmem>>, vector<1x16x128xf32>
    %53 = vector.shape_cast %52 : vector<1x16x128xf32> to vector<16x128xf32>
    %54 = vector.shape_cast %51 : vector<16x128xf32> to vector<1x16x128xf32>
    tpu.vector_store %arg5[%c0_61, %c0_62, %c0_63], %54 {strides = array<i32>} : memref<1x16x128xf32, #tpu.memory_space<vmem>>, vector<1x16x128xf32>,
    return
  }
  func.func @transform_0(%arg0: i32, %arg1: i32) -> (i32, i32, i32) {
    %c0_i32 = arith.constant 0 : i32
    %c0_i32_0 = arith.constant 0 : i32
    return %arg0, %c0_i32, %arg1 : i32, i32, i32
  }
  func.func @transform_1(%arg0: i32, %arg1: i32) -> (i32, i32, i32) {
    %c0_i32 = arith.constant 0 : i32
    %c0_i32_0 = arith.constant 0 : i32
    %c0_i32_1 = arith.constant 0 : i32
    %c0_i32_2 = arith.constant 0 : i32
    return %c0_i32, %c0_i32_0, %c0_i32_1 : i32, i32, i32
  }
  func.func @transform_2(%arg0: i32, %arg1: i32) -> (i32, i32) {
    %c0_i32 = arith.constant 0 : i32
    %c0_i32_0 = arith.constant 0 : i32
    %c0_i32_1 = arith.constant 0 : i32
    return %c0_i32, %c0_i32_0 : i32, i32
  }
  func.func @transform_3(%arg0: i32, %arg1: i32) -> (i32, i32, i32) {
    %c0_i32 = arith.constant 0 : i32
    %c0_i32_0 = arith.constant 0 : i32
    return %arg0, %c0_i32, %arg1 : i32, i32, i32
  }
}

</mosaic_0001>

<bundles_post_ra>
// kernel: tpu_custom_call.1
= control target key start
LH: loop header
LB: loop body
LE: loop exit
PB: predicated region body
PF: predicated region fallthrough
CT: control target
= control target key end

     0   :  { %8 = vsyncpa [#allocation6], 0  ;;  %s1185_s0 = inlined_call_operand.vmem [shape: bf16[2,16,128], index: 0, kind: input, shape index: {}]   ;;  %s1186_s1 = inlined_call_operand.hbm [shape: bf16[5,16,16], index: 1, kind: input, shape index: {}]   ;;  %s1187_s2 = inlined_call_operand.vmem [shape: f32[16,1], index: 2, kind: input, shape index: {}]   ;;  %s1188_s3 = inlined_call_operand.hbm [shape: f32[2,16,128], index: 3, kind: output, shape index: {}]  }
   0x1   :  { %9 = vsyncpa [#allocation7], 0 }
   0x2   :  { %11 = vsyncpa [#allocation7 + $0x1], 0  ;;  %s1006_s12 = smov 0   ;;  %s1008_s13 = smov 0  }
   0x3   :  { %s1010_s14 = smov 0   ;;  %s1012_s15 = smov 0  }
   0x4   :  { %s1014_s16 = smov 0   ;;  %s1016_s17 = smov 0  }
   0x5 LB: > { %s704_s18 = sadd.s32 4294967295, %s970_s17   ;;  %s705_s19 = sadd.s32 4294967294, %s970_s17   ;;  %s970_s17 = sphi %s1016_s17, %s17_s17   ;;  %s966_s16 = sphi %s1014_s16, %s1206_s16   ;;  %s962_s15 = sphi %s1012_s15, %s1205_s15   ;;  %s958_s14 = sphi %s1010_s14, %s1204_s14   ;;  %s954_s13 = sphi %s1008_s13, %s1203_s13   ;;  %s950_s12 = sphi %s1006_s12, %s1202_s12  }
   0x6   : > { %s29_s20 = sadd.s32 1, %s966_s16  ;;  %s108_s21 = sadd.s32 1, %s958_s14 }
   0x7   : > { %p31_p0 = scmp.ge.s32.totalorder %s29_s20, 2  ;;  %p118_p1 = scmp.ne.s32.totalorder %s958_s14, %s954_s13 }
   0x8   : > { %p119_p2 = scmp.eq.s32.totalorder %s704_s18, 1  ;;  %p124_p3 = scmp.ne.s32.totalorder %s954_s13, %s950_s12 }
   0x9   : > { %s1208_s20 = smov (%p31_p0, %s29_s20), 0  ;;  %p125_p5 = scmp.eq.s32.totalorder %s705_s19, 1 }
   0xa   : > { %p1046_p4 = por %p119_p2, %p118_p1  ;;  %s103_s23 = ssub.s32 %s966_s16, %s1208_s20 }
   0xb   : > { %p706_p6 = scmp.ge.s32.totalorder %s970_s17, 1  ;;  %p106_p7 = scmp.eq.s32.totalorder %s103_s23, 0 }
   0xc   : > { %s1193_s22 = scalar_select %p1046_p4, 1, 0 }
   0xd   : > { %p1053_p8 = por %p125_p5, %p124_p3  ;;  %p132_p9 = scmp.lt.s32.totalorder %s970_s17, 3 }
   0xe   : > { %s1059_s25 = scalar_select %p106_p7, %s958_s14, %s108_s21  }
   0xf   : > { %s1194_s24 = scalar_select %p1053_p8, 1, 0 }
  0x10   : > { %p1061_p10 = pnand %p706_p6, %p132_p9  ;;  %p1065_p11 = scmp.eq.s32.totalorder %s704_s18, 0 }
  0x11   : > { %s972_s28 = smov [#allocation5]   ;;  %s860_s6 = scalar_lea.hbm %s1186_s1, 640 }
  0x12   : > { %s1195_s26 = scalar_select %p1061_p10, 1, 0 }
  0x13   : > { %s1196_s27 = scalar_select %p1065_p11, 1, 0 }
  0x14   : > { %p779_p12 = pneg %p1061_p10  ;;  %s144_s29 = sshll.u32 %s972_s28, 4  ;;  %s145_s29 = int_to_ptr.vmem [resolvable:$true] %s144_s29 }
  0x15   : > { %p861_p0 = scmp.ne.s32.totalorder %s1186_s1, %s860_s6  ;;  %p867_p5 = scmp.lt.u32.totalorder %s860_s6, %s1186_s1 }
  0x16   : > { %p1073_p13 = pnand %p1065_p11, %p779_p12 }
  0x18   : > { %p862_p1 = pneg %p1073_p13 }
  0x1a   : > { %p863_p2 = pnand %p862_p1, %p861_p0 }
  0x1c   : > { %p864_p3 = pneg %p863_p2 }
  0x1e   : > { %p869_p6 = pnand %p867_p5, %p864_p3 }
  0x20   : > { %872 = shalt.err (!%p869_p6)
}
  0x21   : > { %s873_s11 = scalar_lea.vmem %s145_s29, 640  ;;  %p881_p8 = scmp.lt.s32.totalorder %s145_s29, %s145_s29 }
  0x22   : > { %p874_p7 = scmp.ne.s32.totalorder %s145_s29, %s873_s11  ;;  %p882_p4 = scmp.lt.s32.totalorder %s873_s11, %s873_s11 }
  0x24   : > { %p876_p9 = pnand %p874_p7, %p862_p1  ;;  %p883_p11 = por %p882_p4, %p881_p8 }
  0x26   : > { %p877_p12 = pneg %p876_p9 }
  0x28   : > { %p884_p10 = pnand %p883_p11, %p877_p12 }
  0x2a   : > { %887 = shalt.err (!%p884_p10)
}
  0x2b   : > { %s973_s18 = smov 64   ;;  %s974_s19 = smov 4  }
  0x2c   : > { %782 = dma.hbm_to_vmem [thread:$0]  (!%p1073_p13), %s1186_s1, 640, %s145_s29, [#allocation6], %s973_s18, %s973_s18, %s974_s19  }
  0x2d   : > { %p1198_p0 = scmp.ne.s32.totalorder %s1195_s26, 0 }
  0x2e   : > { %p1199_p2 = scmp.ne.s32.totalorder (!%p1198_p0), %s1196_s27, 0 }
  0x2f   : > { %174 = sbr.rel (%p1198_p0) target bundleno = 555 (0x22b), region = 32 }
  0x36   : > { %941 = dma.done.wait (%p1199_p2), [#allocation6], 640  }
  0x37   : > { %943 = vsyncadd (%p1199_p2), [#allocation6], 4294966656  ;;  %vm214_vm0 = vcmask 31744   ;;  %v975_v0 = vmov 0   ;;  %p201_p4 = scmp.lt.s32.totalorder %s962_s15, 1  ;;  %s976_s27 = smov 124  }
  0x38   : > { %215 = vst.msk [vmem:[#allocation2] sm:$0xff] %vm214_vm0, %v975_v0  ;;  %851 = vset.pattern.permute.xlu1 %v975_v0  ;;  %852 = vset.pattern.permute.xlu0 %v975_v0  ;;  %s977_s5 = smov 4   ;;  %v978_v3 = vmov 0.0   ;;  %vm221_vm1 = vcmask 1048544   ;;  %vm979_vm2 = vmmov 0   ;;  %s980_s6 = smov 3  }
  0x39   : > { %s202_s28 = scalar_select %p201_p4, %s962_s15, 1  ;;  %743 = vmatprep.subr.bf16.mxu0 %v978_v3  ;;  %749 = vmatprep.subr.bf16.mxu1 %v978_v3  ;;  %v583_v6 = vld [vmem:[%s1187_s2] sm:$0xff]  ;;  %v584_v8 = vld [vmem:[%s1187_s2 + $0x8] sm:$0xff]  ;;  %v854_v13 = vld [vmem:[#allocation5] sm:$0xff]   ;;  %vm266_vm3 = vcmask 130048   ;;  %vm333_vm4 = vcmask 23552  }
  0x3a   : > { %745 = vmatprep.mubr.msk.bf16.mxu0 %vm979_vm2, %v978_v3  ;;  %751 = vmatprep.mubr.msk.bf16.mxu1 %vm979_vm2, %v978_v3  ;;  %s981_s7 = smov 2   ;;  %s982_s8 = smov 1   ;;  %v855_v16 = vld [vmem:[#allocation5 + $0x8] sm:$0xff]   ;;  %vm402_vm5 = vcmask 15360   ;;  %v856_v20 = vld [vmem:[#allocation5 + $0x10] sm:$0xff]   ;;  %vm471_vm6 = vcmask 7168  }
  0x3b   : > { %s731_s29 = sshll.u32 %s202_s28, 3  ;;  %v857_v24 = vld [vmem:[#allocation5 + $0x18] sm:$0xff]   ;;  %v858_v25 = vld [vmem:[#allocation5 + $0x20] sm:$0xff]   ;;  %s198_s19 = sand.u32 1, %s954_s13  }
  0x3c   : > { %s208_s4 = scalar_lea.vmem %s1185_s0, %s731_s29  ;;  %s711_s21 = sshll.u32 %s198_s19, 4 }
  0x3d   : > { %v1105_v1 = vld [vmem:[%s208_s4] sm:$0xff]   ;;  %s200_s23 = scalar_lea.vmem [#allocation8], %s711_s21  ;;  %s732_s29 = sshll.u32 %s962_s15, 8 }
  0x3e   : > { %261 = vrot.lane.b32.xlu1 %v1105_v1, %s977_s5  ;;  %v859_v7 = vld [vmem:[%s208_s4] sm:$0xff]   ;;  %s614_s28 = sshll.u32 %s200_s23, 4  ;;  %s1137_s4 = scalar_lea.hbm %s1188_s3, %s732_s29  ;;  %s1132_s28 = int_to_ptr.vmem [resolvable:$true] %s614_s28 }
  0x3f   : > { %v216_v2 = vld [vmem:[#allocation2] sm:$0xff]  ;;  %s888_s15 = scalar_lea.vmem %s1132_s28, 256  ;;  %p1200_p10 = scmp.ne.s32.totalorder %s1193_s22, 0 }
  0x40   : > { %218 = vrot.lane.b32.xlu0 %v216_v2, %s976_s27  ;;  %s1139_s27 = scalar_lea.sflag [#allocation7], %s198_s19  ;;  %p889_p8 = scmp.ne.s32.totalorder %s1132_s28, %s888_s15 }
  0x42   : > { %p890_p11 = pnand %p889_p8, %p1200_p10 }
  0x44   : > { %p891_p13 = pneg %p890_p11 }
  0xb0   : > { %v262_v9 = vpop.permute.xlu1 %261 }
  0xb2   : > { %v219_v4 = vpop.permute.xlu0 %218 }
  0xb3   : > { %222 = vst.msk [vmem:[#allocation3] sm:$0xff] %vm221_vm1, %v219_v4 }
  0xba   : > { %v320_v5 = vld [vmem:[#allocation3] sm:$0xff] }
  0xbb   : > { %329 = vrot.lane.b32.xlu1 %v320_v5, %s980_s6  ;;  %259 = vrot.lane.b32.xlu0 %v320_v5, %s977_s5 }
  0xbf   : > { %398 = vrot.lane.b32.xlu1 %v320_v5, %s981_s7  ;;  %331 = vrot.lane.b32.xlu0 %v1105_v1, %s980_s6 }
  0xc3   : > { %467 = vrot.lane.b32.xlu1 %v320_v5, %s982_s8  ;;  %400 = vrot.lane.b32.xlu0 %v1105_v1, %s981_s7 }
  0xc7   : > { %469 = vrot.lane.b32.xlu0 %v1105_v1, %s982_s8  ;;  %587 = vperm.xlu1 %851, %v583_v6  }
  0xcb   : > { %592 = vperm.xlu0 %852, %v584_v8   ;;  %239 = vrot.lane.b32.xlu1 %v859_v7, %s977_s5  ;;  %s983_s5 = smov [#allocation8]  }
  0xcc   : > { %s892_s6 = sshll.u32 %s983_s5, 4  ;;  %s893_s6 = int_to_ptr.vmem [resolvable:$false] %s892_s6 }
  0xcd   : > { %s894_s7 = scalar_lea.vmem %s893_s6, 512  ;;  %p895_p1 = scmp.lt.s32.totalorder %s1132_s28, %s893_s6 }
  0xce   : > { %p896_p3 = scmp.lt.s32.totalorder %s894_s7, %s888_s15 }
  0xd0   : > { %p897_p5 = por %p896_p3, %p895_p1 }
  0xd2   : > { %p898_p6 = pnand %p897_p5, %p891_p13 }
 0x12d   : > { %v330_v10 = vpop.permute.xlu1 %329  ;;  %v260_v11 = vpop.permute.xlu0 %259 }
 0x12e   : > { %v264_v12 = vsel %vm214_vm0, %v260_v11, %v262_v9 }
 0x12f   : > { %744 = vmatpush3.bf16.msra.mxu0 %v264_v12 }
 0x130   : > { %755 = vmatprep.subr.bf16.mxu0 %v978_v3 }
 0x131   : > { %v332_v14 = vpop.permute.xlu0 %331  ;;  %v399_v17 = vpop.permute.xlu1 %398 }
 0x132   : > { %746 = vmatmul.mubr.msk.bf16.vlgmr.msra.gmra.mrb[0].mxu0 %vm266_vm3, %v854_v13  ;;  %v334_v15 = vsel %vm333_vm4, %v330_v10, %v332_v14 }
 0x133   : > { %750 = vmatpush3.bf16.msra.mxu1 %v334_v15  ;;  %757 = vmatprep.mubr.msk.bf16.mxu0 %vm979_vm2, %v978_v3 }
 0x134   : > { %761 = vmatprep.subr.bf16.mxu1 %v978_v3 }
 0x135   : > { %v401_v18 = vpop.permute.xlu0 %400  ;;  %v468_v21 = vpop.permute.xlu1 %467 }
 0x136   : > { %v403_v19 = vsel %vm402_vm5, %v399_v17, %v401_v18  ;;  %752 = vmatmul.mubr.msk.bf16.vlgmr.msra.gmra.mrb[0].mxu1 %vm266_vm3, %v855_v16 }
 0x137   : > { %756 = vmatpush3.bf16.msra.mxu0 %v403_v19  ;;  %763 = vmatprep.mubr.msk.bf16.mxu1 %vm979_vm2, %v978_v3 }
 0x138   : > { %767 = vmatprep.subr.bf16.mxu0 %v978_v3 }
 0x139   : > { %v470_v22 = vpop.permute.xlu0 %469 }
 0x13a   : > { %v472_v23 = vsel %vm471_vm6, %v468_v21, %v470_v22  ;;  %758 = vmatmul.mubr.msk.bf16.vlgmr.msra.gmra.mrb[4].mxu0 %vm266_vm3, %v856_v20 }
 0x13b   : > { %762 = vmatpush3.bf16.msra.mxu1 %v472_v23  ;;  %768 = vmatpush3.bf16.msra.mxu0 %v1105_v1 }
 0x13c   : > { %769 = vmatprep.mubr.msk.bf16.mxu0 %vm979_vm2, %v978_v3 }
 0x13e   : > { %764 = vmatmul.mubr.msk.bf16.vlgmr.msra.gmra.mrb[4].mxu1 %vm266_vm3, %v857_v24 }
 0x142   : > { %770 = vmatmul.mubr.msk.bf16.vlgmr.msra.gmra.mrb[8].mxu0 %vm266_vm3, %v858_v25 }
 0x146   : > { %v588_v26 = vpop.permute.xlu1 %587 }
 0x14a   : > { %v240_v27 = vpop.permute.xlu1 %239  ;;  %v593_v54 = vpop.permute.xlu0 %592 }
 0x14b   : > { %243 = vst.msk [vmem:[#allocation2] sm:$0xff] %vm214_vm0, %v240_v27 }
 0x205   : > { %v304_v28 = vpop.f32.mrb[0].mxu0 }
 0x206   : > { %v747_v29 = vpop.f32.mrb[1].mxu0 }
 0x207   : > { %v307_v30 = vpop.f32.mrb[2].mxu0 }
 0x208   : > { %v748_v31 = vpop.f32.mrb[3].mxu0 }
 0x209   : > { %v373_v32 = vpop.f32.mrb[0].mxu1 }
 0x20a   : > { %v380_v33 = vadd.f32 %v373_v32, %v304_v28  ;;  %v753_v34 = vpop.f32.mrb[1].mxu1 }
 0x20b   : > { %v376_v35 = vpop.f32.mrb[2].mxu1 }
 0x20c   : > { %v381_v36 = vadd.f32 %v376_v35, %v307_v30  ;;  %v754_v37 = vpop.f32.mrb[3].mxu1 }
 0x20d   : > { %v442_v38 = vpop.f32.mrb[4].mxu0 }
 0x20e   : > { %v449_v39 = vadd.f32 %v442_v38, %v380_v33  ;;  %v759_v40 = vpop.f32.mrb[5].mxu0 }
 0x20f   : > { %v445_v41 = vpop.f32.mrb[6].mxu0 }
 0x210   : > { %v450_v42 = vadd.f32 %v445_v41, %v381_v36  ;;  %v760_v43 = vpop.f32.mrb[7].mxu0 }
 0x211   : > { %v511_v44 = vpop.f32.mrb[4].mxu1 }
 0x212   : > { %v518_v45 = vadd.f32 %v511_v44, %v449_v39  ;;  %v765_v46 = vpop.f32.mrb[5].mxu1 }
 0x213   : > { %v514_v47 = vpop.f32.mrb[6].mxu1 }
 0x214   : > { %v519_v48 = vadd.f32 %v514_v47, %v450_v42  ;;  %v766_v49 = vpop.f32.mrb[7].mxu1 }
 0x215   : > { %v570_v50 = vpop.f32.mrb[8].mxu0 }
 0x216   : > { %v577_v51 = vadd.f32 %v570_v50, %v518_v45  ;;  %v771_v52 = vpop.f32.mrb[9].mxu0 }
 0x217   : > { %v573_v53 = vpop.f32.mrb[10].mxu0 }
 0x218   : > { %v595_v55 = vadd.f32 %v588_v26, %v577_v51  ;;  %v578_v56 = vadd.f32 %v573_v53, %v519_v48  ;;  %v772_v57 = vpop.f32.mrb[11].mxu0 }
 0x21a   : > { %597 = vst [vmem:[%s200_s23] sm:$0xff] %v595_v55  ;;  %v596_v58 = vadd.f32 %v593_v54, %v578_v56 }
 0x21c   : > { %598 = vst [vmem:[%s200_s23 + $0x8] sm:$0xff] %v596_v58 }
 0x21d   : > { %901 = shalt.err (!%p898_p6)
}
 0x21e   : > { %s902_s8 = scalar_lea.hbm %s1137_s4, 256  ;;  %s906_s11 = scalar_lea.hbm %s1188_s3, 512 }
 0x21f   : > { %p903_p7 = scmp.ne.s32.totalorder %s1137_s4, %s902_s8  ;;  %p907_p0 = scmp.lt.u32.totalorder %s1137_s4, %s1188_s3 }
 0x220   : > { %p908_p2 = scmp.lt.u32.totalorder %s906_s11, %s902_s8  ;;  %p910_p8 = scmp.lt.u32.totalorder %s902_s8, %s1137_s4 }
 0x221   : > { %p904_p9 = pnand %p903_p7, %p1200_p10 }
 0x222   : > { %p909_p4 = por %p908_p2, %p907_p0 }
 0x223   : > { %p905_p12 = pneg %p904_p9 }
 0x224   : > { %p911_p11 = por %p910_p8, %p909_p4 }
 0x226   : > { %p912_p13 = pnand %p911_p11, %p905_p12 }
 0x228   : > { %915 = shalt.err (!%p912_p13)
}
 0x229   : > { %s984_s21 = smov 128   ;;  %s985_s23 = smov 8  }
 0x22a   : > { %777 = dma.vmem_to_hbm [thread:$0]  (%p1200_p10), %s1132_s28, 256, %s1137_s4, %s1139_s27, %s984_s21, %s984_s21, %s985_s23  }
 0x22b PF: > { %p789_p1 = scmp.ge.s32.totalorder %s970_s17, 2  ;;  %s629_s29 = sand.u32 1, %s950_s12  }
 0x22c   : > { %p1201_p3 = scmp.ne.s32.totalorder %s1194_s24, 0  ;;  %s630_s30 = scalar_lea.sflag [#allocation7], %s629_s29 }
 0x22e   : > { %p784_p5 = pnand %p789_p1, %p1201_p3 }
 0x230   : > { %945 = dma.done.wait (!%p784_p5), %s630_s30, 256  }
 0x231   : > { %947 = vsyncadd (!%p784_p5), %s630_s30, 4294967040  ;;  %s17_s17 = sadd.s32 1, %s970_s17   ;;  %s1202_s12 = smov %s954_s13 }
 0x232   : > { %p14_p6 = scmp.ge.s32.totalorder %s17_s17, 4   ;;  %s1203_s13 = smov %s958_s14 }
 0x233   : > { %s1204_s14 = smov %s1059_s25  ;;  %s1205_s15 = smov %s966_s16 }
 0x234   : > { %s1206_s16 = smov %s1208_s20  ;;  %16 = sbr.rel (!%p14_p6) target bundleno = 5 (0x5), region = 80 }
 0x23b   :  { %635 = vsyncpa [#allocation6], 1 }
 0x23c   :  { %637 = vsyncpa [#allocation6 + $0x1], 1 }
 0x23d   :  { %638 = vsyncpa [#allocation7], 1 }
 0x23e   :  { %640 = vsyncpa [#allocation7 + $0x1], 1 }

</bundles_post_ra>
